<compile_context>
chip_gen: v7x
topology: tpu7x:2x2x1
jax: 0.10.0
libtpu: 0.0.40
codegen_flags: <defaults>
</compile_context>

<pallas_src>
import functools

import jax
import jax.numpy as jnp
from jax import lax
from jax.experimental import pallas as pl
from jax.experimental.pallas import tpu as pltpu

_LANES = 128
_SUBLANES = 8


def _jsd_partial_kernel(x_ref, y_ref, o_ref, *, batch_size, block_rows):
    """Partial sum of avg*(2*log(avg) - lp1 - lp2) for one (block_rows, C) tile."""
    i = pl.program_id(0)

    x = x_ref[...].astype(jnp.float32)
    y = y_ref[...].astype(jnp.float32)

    # Mask rows past the true batch size (partial last tile): sanitize the
    # logits so every row has a well-defined softmax, and zero their
    # contribution to the reduction.
    row = i * block_rows + lax.broadcasted_iota(jnp.int32, x.shape, 0)
    valid = row < batch_size
    x = jnp.where(valid, x, 0.0)
    y = jnp.where(valid, y, 0.0)

    def softmax_and_logsoftmax(z):
        m = jnp.max(z, axis=1, keepdims=True)            # XLU row max
        s = z - m
        e = jnp.exp(s)                                   # 1 exp / element (EUP)
        sumexp = jnp.sum(e, axis=1, keepdims=True)       # XLU row reduce
        p = e * pl.reciprocal(sumexp, approx=False)      # reuse e; no exp(lp)
        lp = s - jnp.log(sumexp)                         # 1 log / row
        return p, lp

    p1, lp1 = softmax_and_logsoftmax(x)
    p2, lp2 = softmax_and_logsoftmax(y)

    avg = 0.5 * (p1 + p2)                                # strictly > 0
    term = avg * (2.0 * jnp.log(avg) - lp1 - lp2)        # fused KL1 + KL2
    term = jnp.where(valid, term, 0.0)

    partial = jnp.sum(term)                              # scalar for this tile
    o_ref[...] = jnp.broadcast_to(partial, o_ref.shape)  # lane-dense store


def js_divergence(net1_logits: jax.Array, net2_logits: jax.Array,
                  *, block_rows: int | None = None) -> jax.Array:
    """JS divergence between two (B, C) logit tensors; returns scalar f32."""
    assert net1_logits.shape == net2_logits.shape
    assert net1_logits.ndim == 2
    B, C = net1_logits.shape

    if block_rows is None:
        # Keep 2 inputs x 2 pipeline buffers x TB x C x 4B around ~8 MiB so
        # double buffering survives even on v7x's smaller VMEM.
        budget = 8 * 1024 * 1024
        tb = budget // (2 * 2 * C * 4)
        block_rows = max(_SUBLANES, min(512, (tb // _SUBLANES) * _SUBLANES))
    # Tile height: multiple of 8 sublanes, no larger than the padded batch.
    block_rows = min(block_rows, ((B + _SUBLANES - 1) // _SUBLANES) * _SUBLANES)
    block_rows = max(_SUBLANES, (block_rows // _SUBLANES) * _SUBLANES)

    n_tiles = pl.cdiv(B, block_rows)
    kernel = functools.partial(
        _jsd_partial_kernel, batch_size=B, block_rows=block_rows)

    partials = pl.pallas_call(
        kernel,
        out_shape=jax.ShapeDtypeStruct((n_tiles, _SUBLANES, _LANES), jnp.float32),
        grid_spec=pltpu.PrefetchScalarGridSpec(
            num_scalar_prefetch=0,
            grid=(n_tiles,),
            in_specs=[
                pl.BlockSpec((block_rows, C), lambda i: (i, 0)),
                pl.BlockSpec((block_rows, C), lambda i: (i, 0)),
            ],
            out_specs=pl.BlockSpec((1, _SUBLANES, _LANES), lambda i: (i, 0, 0)),
        ),
        compiler_params=pltpu.CompilerParams(
            dimension_semantics=("parallel",),        # megacore on v7x
            vmem_limit_bytes=32 * 1024 * 1024,
        ),
    )(net1_logits, net2_logits)

    # reduction='batchmean' on each KL, then averaged: sum / (2 * B_true).
    return jnp.sum(partials[:, 0, 0]) / jnp.float32(2 * B)


def _js_divergence_ref(x, y):
    # Pure-JAX reference mirroring the PyTorch module semantics.
    x = x.astype(jnp.float32)
    y = y.astype(jnp.float32)
    lp1 = jax.nn.log_softmax(x, axis=1)
    lp2 = jax.nn.log_softmax(y, axis=1)
    p1 = jnp.exp(lp1)
    p2 = jnp.exp(lp2)
    avg = 0.5 * (p1 + p2)
    B = x.shape[0]
    kl1 = jnp.sum(avg * (jnp.log(avg) - lp1)) / B
    kl2 = jnp.sum(avg * (jnp.log(avg) - lp2)) / B
    return (kl1 + kl2) / 2.0


if __name__ == "__main__":
    key = jax.random.PRNGKey(0)

    def _check(B, C, dtype, block_rows, tol):
        k = jax.random.fold_in(key, B * 1000 + C)
        k1, k2 = jax.random.split(k)
        x = jax.random.normal(k1, (B, C), dtype=jnp.float32).astype(dtype)
        y = jax.random.normal(k2, (B, C), dtype=jnp.float32).astype(dtype)
        out = jax.block_until_ready(js_divergence(x, y, block_rows=block_rows))
        ref = _js_divergence_ref(x, y)
        assert jnp.allclose(out, ref, atol=tol, rtol=tol), (B, C, dtype, out, ref)

    # Tiled path: two full (8, 128) tiles.
    _check(16, 128, jnp.float32, 8, 1e-5)
    # Partial last tile (row masking path): B=12 with TB=8.
    _check(12, 256, jnp.float32, 8, 1e-5)
    # bf16 inputs (halved HBM traffic), default tile-size selection.
    _check(16, 128, jnp.bfloat16, None, 1e-4)

    print("KERNEL_OK")
</pallas_src>

<mosaic_0001>
module attributes {stable_mosaic.version = 11 : i64} {
  func.func @_jsd_partial_kernel(%arg0: i32, %arg1: memref<8x128xf32, #tpu.memory_space<vmem>>, %arg2: memref<8x128xf32, #tpu.memory_space<vmem>>, %arg3: memref<1x8x128xf32, #tpu.memory_space<vmem>>) attributes {dimension_semantics = [#tpu.dimension_semantics<parallel>], iteration_bounds = array<i64: 2>, scalar_prefetch = 0 : i64, scratch_operands = 0 : i64, tpu.core_type = #tpu.core_type<tc>, window_params = [{transform_indices = @transform_0, window_bounds = array<i64: 8, 128>}, {transform_indices = @transform_1, window_bounds = array<i64: 8, 128>}, {transform_indices = @transform_2, window_bounds = array<i64: 1, 8, 128>}]} {
    %c0 = arith.constant 0 : index
    %c0_0 = arith.constant 0 : index
    %0 = vector.load %arg1[%c0, %c0_0] : memref<8x128xf32, #tpu.memory_space<vmem>>, vector<8x128xf32>
    %c0_1 = arith.constant 0 : index
    %c0_2 = arith.constant 0 : index
    %1 = vector.load %arg2[%c0_1, %c0_2] : memref<8x128xf32, #tpu.memory_space<vmem>>, vector<8x128xf32>
    %c8_i32 = arith.constant 8 : i32
    %2 = arith.muli %arg0, %c8_i32 : i32
    %3 = tpu.iota {dimensions = array<i32: 0>} : vector<8x128xi32>
    %4 = vector.broadcast %2 : i32 to vector<8x128xi32>
    %5 = arith.addi %4, %3 : vector<8x128xi32>
    %c16_i32 = arith.constant 16 : i32
    %6 = vector.broadcast %c16_i32 : i32 to vector<8x128xi32>
    %7 = arith.cmpi slt, %5, %6 : vector<8x128xi32>
    %cst = arith.constant 0.000000e+00 : f32
    %8 = vector.broadcast %cst : f32 to vector<8x128xf32>
    %9 = arith.select %7, %0, %8 : vector<8x128xi1>, vector<8x128xf32>
    %cst_3 = arith.constant 0.000000e+00 : f32
    %10 = vector.broadcast %cst_3 : f32 to vector<8x128xf32>
    %11 = arith.select %7, %1, %10 : vector<8x128xi1>, vector<8x128xf32>
    %cst_4 = arith.constant dense<0xFF800000> : vector<8xf32>
    %12 = vector.multi_reduction <maximumf>, %9, %cst_4 [1] : vector<8x128xf32> to vector<8xf32>
    %13 = vector.shape_cast %12 : vector<8xf32> to vector<8x1xf32>
    %14 = vector.broadcast %13 : vector<8x1xf32> to vector<8x128xf32>
    %15 = arith.subf %9, %14 : vector<8x128xf32>
    %16 = math.exp %15 : vector<8x128xf32>
    %cst_5 = arith.constant dense<0.000000e+00> : vector<8xf32>
    %17 = vector.multi_reduction <add>, %16, %cst_5 [1] : vector<8x128xf32> to vector<8xf32>
    %18 = vector.shape_cast %17 : vector<8xf32> to vector<8x1xf32>
    %19 = tpu.reciprocal %18 : vector<8x1xf32> -> vector<8x1xf32>
    %20 = vector.broadcast %19 : vector<8x1xf32> to vector<8x128xf32>
    %21 = arith.mulf %16, %20 : vector<8x128xf32>
    %22 = math.log %18 : vector<8x1xf32>
    %23 = vector.broadcast %22 : vector<8x1xf32> to vector<8x128xf32>
    %24 = arith.subf %15, %23 : vector<8x128xf32>
    %cst_6 = arith.constant dense<0xFF800000> : vector<8xf32>
    %25 = vector.multi_reduction <maximumf>, %11, %cst_6 [1] : vector<8x128xf32> to vector<8xf32>
    %26 = vector.shape_cast %25 : vector<8xf32> to vector<8x1xf32>
    %27 = vector.broadcast %26 : vector<8x1xf32> to vector<8x128xf32>
    %28 = arith.subf %11, %27 : vector<8x128xf32>
    %29 = math.exp %28 : vector<8x128xf32>
    %cst_7 = arith.constant dense<0.000000e+00> : vector<8xf32>
    %30 = vector.multi_reduction <add>, %29, %cst_7 [1] : vector<8x128xf32> to vector<8xf32>
    %31 = vector.shape_cast %30 : vector<8xf32> to vector<8x1xf32>
    %32 = tpu.reciprocal %31 : vector<8x1xf32> -> vector<8x1xf32>
    %33 = vector.broadcast %32 : vector<8x1xf32> to vector<8x128xf32>
    %34 = arith.mulf %29, %33 : vector<8x128xf32>
    %35 = math.log %31 : vector<8x1xf32>
    %36 = vector.broadcast %35 : vector<8x1xf32> to vector<8x128xf32>
    %37 = arith.subf %28, %36 : vector<8x128xf32>
    %38 = arith.addf %21, %34 : vector<8x128xf32>
    %cst_8 = arith.constant 5.000000e-01 : f32
    %39 = vector.broadcast %cst_8 : f32 to vector<8x128xf32>
    %40 = arith.mulf %39, %38 : vector<8x128xf32>
    %41 = math.log %40 : vector<8x128xf32>
    %cst_9 = arith.constant 2.000000e+00 : f32
    %42 = vector.broadcast %cst_9 : f32 to vector<8x128xf32>
    %43 = arith.mulf %42, %41 : vector<8x128xf32>
    %44 = arith.subf %43, %24 : vector<8x128xf32>
    %45 = arith.subf %44, %37 : vector<8x128xf32>
    %46 = arith.mulf %40, %45 : vector<8x128xf32>
    %cst_10 = arith.constant 0.000000e+00 : f32
    %47 = vector.broadcast %cst_10 : f32 to vector<8x128xf32>
    %48 = arith.select %7, %46, %47 : vector<8x128xi1>, vector<8x128xf32>
    %49 = vector.shape_cast %48 : vector<8x128xf32> to vector<1x8x128xf32>
    %cst_11 = arith.constant dense<0.000000e+00> : vector<1xf32>
    %50 = vector.multi_reduction <add>, %49, %cst_11 [1, 2] : vector<1x8x128xf32> to vector<1xf32>
    %51 = vector.shape_cast %50 : vector<1xf32> to vector<1x1x1xf32>
    %52 = vector.extract %51[0, 0, 0] : f32 from vector<1x1x1xf32>
    %53 = vector.broadcast %52 : f32 to vector<1x8x128xf32>
    %c0_12 = arith.constant 0 : index
    %c0_13 = arith.constant 0 : index
    %c0_14 = arith.constant 0 : index
    %54 = vector.load %arg3[%c0_12, %c0_13, %c0_14] : memref<1x8x128xf32, #tpu.memory_space<vmem>>, vector<1x8x128xf32>
    tpu.vector_store %arg3[%c0_12, %c0_13, %c0_14], %53 {strides = array<i32>} : memref<1x8x128xf32, #tpu.memory_space<vmem>>, vector<1x8x128xf32>,
    return
  }
  func.func @transform_0(%arg0: i32) -> (i32, i32) {
    %c0_i32 = arith.constant 0 : i32
    %c0_i32_0 = arith.constant 0 : i32
    return %arg0, %c0_i32 : i32, i32
  }
  func.func @transform_1(%arg0: i32) -> (i32, i32) {
    %c0_i32 = arith.constant 0 : i32
    %c0_i32_0 = arith.constant 0 : i32
    return %arg0, %c0_i32 : i32, i32
  }
  func.func @transform_2(%arg0: i32) -> (i32, i32, i32) {
    %c0_i32 = arith.constant 0 : i32
    %c0_i32_0 = arith.constant 0 : i32
    %c0_i32_1 = arith.constant 0 : i32
    return %arg0, %c0_i32, %c0_i32_0 : i32, i32, i32
  }
}

</mosaic_0001>

<bundles_post_ra>
// kernel: tpu_custom_call.1
= control target key start
LH: loop header
LB: loop body
LE: loop exit
PB: predicated region body
PF: predicated region fallthrough
CT: control target
= control target key end

     0   :  { %7 = vsyncpa [#allocation3], 0  ;;  %s808_s0 = inlined_call_operand.hbm [shape: f32[16,128], index: 0, kind: input, shape index: {}]   ;;  %s809_s1 = inlined_call_operand.hbm [shape: f32[16,128], index: 1, kind: input, shape index: {}]   ;;  %s810_s2 = inlined_call_operand.hbm [shape: f32[2,8,128], index: 2, kind: output, shape index: {}]  }
   0x1   :  { %9 = vsyncpa [#allocation3 + $0x1], 0 }
   0x2   :  { %10 = vsyncpa [#allocation6], 0 }
   0x3   :  { %12 = vsyncpa [#allocation6 + $0x1], 0 }
   0x4   :  { %13 = vsyncpa [#allocation4], 0 }
   0x5   :  { %15 = vsyncpa [#allocation4 + $0x1], 0  ;;  %s590_s9 = smov 0   ;;  %s592_s10 = smov 0  }
   0x6   :  { %s594_s11 = smov 0   ;;  %s596_s12 = smov 0  }
   0x7 LB: > { %s611_s13 = sadd.s32 4294967295, %s570_s12   ;;  %s357_s14 = sadd.s32 4294967294, %s570_s12   ;;  %s570_s12 = sphi %s596_s12, %s829_s12   ;;  %s566_s11 = sphi %s594_s11, %s828_s11   ;;  %s562_s10 = sphi %s592_s10, %s827_s10   ;;  %s558_s9 = sphi %s590_s9, %s826_s9  }
   0x8   : > { %s615_s15 = sadd.s32 1, %s570_s12   ;;  %s28_s16 = sadd.s32 1, %s566_s11 }
   0x9   : > { %s25_s17 = ssub.s32 %s570_s12, %s615_s15  ;;  %p35_p0 = scmp.ne.s32.totalorder %s566_s11, %s562_s10 }
   0xa   : > { %p26_p1 = scmp.eq.s32.totalorder %s25_s17, 0  ;;  %p36_p2 = scmp.eq.s32.totalorder %s570_s12, 0 }
   0xb   : > { %p41_p3 = scmp.ne.s32.totalorder %s562_s10, %s558_s9  ;;  %p42_p4 = scmp.eq.s32.totalorder %s611_s13, 0 }
   0xc   : > { %s627_s18 = scalar_select %p26_p1, %s566_s11, %s28_s16  }
   0xd   : > { %p629_p5 = por %p36_p2, %p35_p0  ;;  %p633_p6 = por %p42_p4, %p41_p3 }
   0xe   : > { %p91_p7 = scmp.eq.s32.totalorder %s611_s13, 1  ;;  %p97_p8 = scmp.eq.s32.totalorder %s357_s14, 1 }
   0xf   : > { %s814_s20 = scalar_select %p633_p6, 1, 0 }
  0x10   : > { %p392_p10 = scmp.lt.s32.totalorder %s570_s12, 2  ;;  %p640_p11 = por %p91_p7, %p35_p0 }
  0x11   : > { %p644_p12 = por %p97_p8, %p41_p3  ;;  %s649_s23 = sand.u32 1, %s566_s11  }
  0x12   : > { %s815_s21 = scalar_select %p640_p11, 1, 0 }
  0x13   : > { %s816_s22 = scalar_select %p644_p12, 1, 0 }
  0x14   : > { %s361_s24 = sshll.u32 %s570_s12, 7  ;;  %s360_s25 = sshll.u32 %s649_s23, 3 }
  0x15   : > { %s658_s28 = scalar_lea.hbm %s808_s0, %s361_s24  ;;  %s121_s29 = scalar_lea.vmem [#allocation2], %s360_s25 }
  0x16   : > { %s128_s30 = sshll.u32 %s121_s29, 4  ;;  %p664_p13 = pnand %p392_p10, %p629_p5  ;;  %s668_s30 = int_to_ptr.vmem [resolvable:$true] %s128_s30 }
  0x17   : > { %s118_s4 = scalar_lea.sflag [#allocation3], %s649_s23  ;;  %s440_s5 = scalar_lea.hbm %s658_s28, 128 }
  0x18   : > { %p441_p2 = scmp.ne.s32.totalorder %s658_s28, %s440_s5  ;;  %p442_p3 = pneg %p664_p13 }
  0x19   : > { %s445_s8 = scalar_lea.hbm %s808_s0, 256  ;;  %p446_p5 = scmp.lt.u32.totalorder %s658_s28, %s808_s0 }
  0x1a   : > { %p443_p4 = pnand %p442_p3, %p441_p2  ;;  %p447_p8 = scmp.lt.u32.totalorder %s445_s8, %s440_s5 }
  0x1b   : > { %p449_p9 = scmp.lt.u32.totalorder %s440_s5, %s658_s28 }
  0x1c   : > { %p444_p7 = pneg %p443_p4  ;;  %p448_p10 = por %p447_p8, %p446_p5 }
  0x1e   : > { %p450_p0 = por %p449_p9, %p448_p10 }
  0x20   : > { %p451_p1 = pnand %p450_p0, %p444_p7 }
  0x22   : > { %454 = shalt.err (!%p451_p1)
}
  0x23   : > { %s455_s17 = scalar_lea.vmem %s668_s30, 128  ;;  %s572_s19 = smov [#allocation2]  }
  0x24   : > { %p456_p2 = scmp.ne.s32.totalorder %s668_s30, %s455_s17  ;;  %s460_s26 = sshll.u32 %s572_s19, 4  ;;  %s461_s26 = int_to_ptr.vmem [resolvable:$false] %s460_s26 }
  0x25   : > { %s462_s27 = scalar_lea.vmem %s461_s26, 256  ;;  %p463_p11 = scmp.lt.s32.totalorder %s668_s30, %s461_s26 }
  0x26   : > { %p458_p4 = pnand %p456_p2, %p442_p3  ;;  %p464_p5 = scmp.lt.s32.totalorder %s462_s27, %s455_s17 }
  0x28   : > { %p459_p12 = pneg %p458_p4  ;;  %p465_p8 = por %p464_p5, %p463_p11 }
  0x2a   : > { %p466_p9 = pnand %p465_p8, %p459_p12 }
  0x2c   : > { %469 = shalt.err (!%p466_p9)
}
  0x2d   : > { %384 = dma.hbm_to_vmem [thread:$0]  (!%p664_p13), %s658_s28, 128, %s668_s30, %s118_s4  }
  0x2e   : > { %p818_p0 = scmp.lt.s32.totalorder %s570_s12, 3  ;;  %p819_p1 = scmp.ge.s32.totalorder %s570_s12, 1 }
  0x2f   : > { %s711_s7 = scalar_lea.hbm %s809_s1, %s361_s24  ;;  %s139_s8 = scalar_lea.vmem [#allocation5], %s360_s25 }
  0x30   : > { %p702_p7 = pnand %p819_p1, %p818_p0  ;;  %s146_s14 = sshll.u32 %s139_s8, 4  ;;  %s147_s14 = int_to_ptr.vmem [resolvable:$true] %s146_s14 }
  0x31   : > { %s136_s28 = scalar_lea.sflag [#allocation6], %s649_s23  ;;  %s470_s30 = scalar_lea.hbm %s711_s7, 128 }
  0x32   : > { %s820_s29 = scalar_select %p702_p7, 1, 0 }
  0x33   : > { %p471_p11 = scmp.ne.s32.totalorder %s711_s7, %s470_s30  ;;  %s475_s24 = scalar_lea.hbm %s809_s1, 256 }
  0x34   : > { %p476_p2 = scmp.lt.u32.totalorder %s711_s7, %s809_s1  ;;  %p477_p4 = scmp.lt.u32.totalorder %s475_s24, %s470_s30 }
  0x35   : > { %p473_p12 = pnand %p471_p11, %p442_p3  ;;  %p479_p8 = scmp.lt.u32.totalorder %s470_s30, %s711_s7 }
  0x36   : > { %p478_p5 = por %p477_p4, %p476_p2 }
  0x37   : > { %p474_p10 = pneg %p473_p12 }
  0x38   : > { %p480_p9 = por %p479_p8, %p478_p5 }
  0x3a   : > { %p481_p0 = pnand %p480_p9, %p474_p10 }
  0x3c   : > { %484 = shalt.err (!%p481_p0)
}
  0x3d   : > { %s485_s23 = scalar_lea.vmem %s147_s14, 128  ;;  %s573_s25 = smov [#allocation5]  }
  0x3e   : > { %p486_p1 = scmp.ne.s32.totalorder %s147_s14, %s485_s23  ;;  %s490_s26 = sshll.u32 %s573_s25, 4  ;;  %s491_s26 = int_to_ptr.vmem [resolvable:$false] %s490_s26 }
  0x3f   : > { %s492_s27 = scalar_lea.vmem %s491_s26, 256  ;;  %p493_p6 = scmp.lt.s32.totalorder %s147_s14, %s491_s26 }
  0x40   : > { %p488_p11 = pnand %p486_p1, %p442_p3  ;;  %p494_p7 = scmp.lt.s32.totalorder %s492_s27, %s485_s23 }
  0x42   : > { %p489_p12 = pneg %p488_p11  ;;  %p495_p2 = por %p494_p7, %p493_p6 }
  0x44   : > { %p496_p4 = pnand %p495_p2, %p489_p12 }
  0x46   : > { %499 = shalt.err (!%p496_p4)
}
  0x47   : > { %387 = dma.hbm_to_vmem [thread:$0]  (!%p664_p13), %s711_s7, 128, %s147_s14, %s136_s28  }
  0x48   : > { %p821_p10 = scmp.ne.s32.totalorder %s820_s29, 0 }
  0x49   : > { %s738_s5 = sand.u32 (!%p821_p10), 1, %s562_s10   ;;  %p822_p6 = scmp.ne.s32.totalorder (!%p821_p10), %s814_s20, 0 }
  0x4a   : > { %155 = sbr.rel (%p821_p10) target bundleno = 653 (0x28d), region = 28  ;;  %s741_s6 = sshll.u32 (!%p821_p10), %s738_s5, 3 }
  0x4b   : > { %s158_s8 = scalar_lea.sflag (!%p821_p10), [#allocation3], %s738_s5  ;;  %s161_s30 = scalar_lea.vmem (!%p821_p10), [#allocation2], %s741_s6 }
  0x51   : > { %545 = dma.done.wait (%p822_p6), %s158_s8, 128  }
  0x52   : > { %547 = vsyncadd (%p822_p6), %s158_s8, 4294967168  ;;  %s167_s3 = scalar_lea.sflag [#allocation6], %s738_s5  ;;  %s170_s29 = scalar_lea.vmem [#allocation5], %s741_s6 }
  0x53   : > { %549 = dma.done.wait (%p822_p6), %s167_s3, 128  }
  0x54   : > { %551 = vsyncadd (%p822_p6), %s167_s3, 4294967168  ;;  %s368_s7 = sshll.u32 %s611_s13, 3  ;;  %v199_v0 = vlaneseq  ;;  %v196_v4 = vld [vmem:[%s161_s30] sm:$0xff]  ;;  %v197_v5 = vld [vmem:[%s170_s29] sm:$0xff]  ;;  %s195_s20 = scalar_lea.vmem [#allocation7], %s741_s6 }
  0x55   : > { %v201_v1 = vstv %s368_s7  ;;  %s264_s14 = sshll.u32 %s195_s20, 4  ;;  %s370_s28 = sshll.u32 %s611_s13, 7  ;;  %s761_s14 = int_to_ptr.vmem [resolvable:$true] %s264_s14 }
  0x56   : > { %v200_v2 = vshrl.u32 %v199_v0, 7  ;;  %s766_s17 = scalar_lea.hbm %s810_s2, %s370_s28  ;;  %s251_s19 = scalar_lea.sflag [#allocation4], %s738_s5 }
  0x57   : > { %s500_s23 = scalar_lea.vmem %s761_s14, 128  ;;  %p823_p3 = scmp.ne.s32.totalorder %s815_s21, 0 }
  0x58   : > { %v202_v3 = vadd.s32 %v201_v1, %v200_v2  ;;  %p501_p13 = scmp.ne.s32.totalorder %s761_s14, %s500_s23  ;;  %s574_s13 = smov [#allocation7]  }
  0x59   : > { %s504_s25 = sshll.u32 %s574_s13, 4  ;;  %s505_s25 = int_to_ptr.vmem [resolvable:$false] %s504_s25 }
  0x5a   : > { %vm203_vm0 = vcmp.lt.s32.totalorder %v202_v3, 16  ;;  %p502_p7 = pnand %p501_p13, %p823_p3  ;;  %s506_s26 = scalar_lea.vmem %s505_s25, 256 }
  0x5b   : > { %v204_v6 = vsel %vm203_vm0, %v196_v4, 0.0  ;;  %v205_v7 = vsel %vm203_vm0, %v197_v5, 0.0  ;;  %p507_p8 = scmp.lt.s32.totalorder %s761_s14, %s505_s25  ;;  %p508_p9 = scmp.lt.s32.totalorder %s506_s26, %s500_s23 }
  0x5c   : > { %206 = vmax.xlane.f32.xlu0 %v204_v6  ;;  %p503_p5 = pneg %p502_p7 }
  0x5d   : > { %p509_p0 = por %p508_p9, %p507_p8 }
  0x5f   : > { %p510_p1 = pnand %p509_p0, %p503_p5 }
  0x60   : > { %218 = vmax.xlane.f32.xlu0 %v205_v7 }
  0xe9   : > { %v207_v8 = vpop.xlane.xlu0 %206 }
  0xea   : > { %v208_v9 = vsub.f32 %v204_v6, %v207_v8 }
  0xec   : > { %v209_v10 = vmul.f32 1.442695, %v208_v9 }
  0xed   : > { %v219_v11 = vpop.xlane.xlu0 %218 }
  0xee   : > { %426 = vpow2.f32 %v209_v10  ;;  %v220_v12 = vsub.f32 %v205_v7, %v219_v11 }
  0xf0   : > { %v221_v13 = vmul.f32 1.442695, %v220_v12 }
  0xf2   : > { %428 = vpow2.f32 %v221_v13 }
  0xf8   : > { %v427_v14 = vpop.eup %426 }
  0xf9   : > { %211 = vadd.xlane.f32.xlu1 %v427_v14 }
  0xfc   : > { %v429_v15 = vpop.eup %428 }
  0xfd   : > { %223 = vadd.xlane.f32.xlu1 %v429_v15 }
 0x186   : > { %v212_v16 = vpop.xlane.xlu1 %211 }
 0x187   : > { %430 = vrcp.f32 %v212_v16 }
 0x18a   : > { %v224_v17 = vpop.xlane.xlu1 %223 }
 0x18b   : > { %432 = vrcp.f32 %v224_v17 }
 0x18c   : > { %434 = vlog2.f32 %v212_v16 }
 0x18d   : > { %436 = vlog2.f32 %v224_v17 }
 0x191   : > { %v431_v18 = vpop.eup %430 }
 0x192   : > { %v214_v20 = vmul.f32 %v431_v18, %v427_v14 }
 0x195   : > { %v433_v19 = vpop.eup %432 }
 0x196   : > { %v226_v21 = vmul.f32 %v433_v19, %v429_v15  ;;  %v435_v24 = vpop.eup %434 }
 0x197   : > { %v437_v25 = vpop.eup %436  ;;  %v216_v26 = vmul.f32 0.6931472, %v435_v24 }
 0x198   : > { %v230_v22 = vadd.f32 %v226_v21, %v214_v20  ;;  %v228_v28 = vmul.f32 0.6931472, %v437_v25 }
 0x199   : > { %v217_v30 = vsub.f32 %v208_v9, %v216_v26 }
 0x19a   : > { %v231_v23 = vmul.f32 0.5, %v230_v22  ;;  %v229_v32 = vsub.f32 %v220_v12, %v228_v28 }
 0x19c   : > { %438 = vlog2.f32 %v231_v23 }
 0x1a6   : > { %v439_v27 = vpop.eup %438 }
 0x1a7   : > { %v233_v29 = vmul.f32 0.6931472, %v439_v27 }
 0x1a9   : > { %v234_v31 = vmul.f32 2.0, %v233_v29 }
 0x1ab   : > { %v235_v33 = vsub.f32 %v234_v31, %v217_v30 }
 0x1ad   : > { %v236_v34 = vsub.f32 %v235_v33, %v229_v32 }
 0x1af   : > { %v237_v35 = vmul.f32 %v236_v34, %v231_v23 }
 0x1b1   : > { %v238_v36 = vsel %vm203_vm0, %v237_v35, 0.0 }
 0x1b2   : > { %239 = vadd.xlane.f32.xlu0 %v238_v36 }
 0x23f   : > { %v240_v37 = vpop.xlane.xlu0 %239 }
 0x240   : > { %v241_v38 = vrot.slane %v240_v37, 4 }
 0x242   : > { %v242_v39 = vadd.f32 %v241_v38, %v240_v37 }
 0x244   : > { %v243_v40 = vrot.slane %v242_v39, 2 }
 0x246   : > { %v244_v41 = vadd.f32 %v243_v40, %v242_v39 }
 0x248   : > { %v245_v42 = vrot.slane %v244_v41, 1 }
 0x24a   : > { %v246_v43 = vadd.f32 %v245_v42, %v244_v41 }
 0x24c   : > { %373 = vpush %v246_v43 }
 0x27d   : > { %s374_s4 = spop %373 }
 0x27e   : > { %v248_v44 = vstv %s374_s4 }
 0x27f   : > { %249 = vst [vmem:[%s195_s20] sm:$0xff] %v248_v44 }
 0x280   : > { %513 = shalt.err (!%p510_p1)
}
 0x281   : > { %s514_s27 = scalar_lea.hbm %s766_s17, 128  ;;  %s518_s8 = scalar_lea.hbm %s810_s2, 256 }
 0x282   : > { %p515_p11 = scmp.ne.s32.totalorder %s766_s17, %s514_s27  ;;  %p519_p4 = scmp.lt.u32.totalorder %s766_s17, %s810_s2 }
 0x283   : > { %p520_p10 = scmp.lt.u32.totalorder %s518_s8, %s514_s27  ;;  %p522_p13 = scmp.lt.u32.totalorder %s514_s27, %s766_s17 }
 0x284   : > { %p516_p12 = pnand %p515_p11, %p823_p3 }
 0x285   : > { %p521_p6 = por %p520_p10, %p519_p4 }
 0x286   : > { %p517_p2 = pneg %p516_p12 }
 0x287   : > { %p523_p7 = por %p522_p13, %p521_p6 }
 0x289   : > { %p524_p5 = pnand %p523_p7, %p517_p2 }
 0x28b   : > { %527 = shalt.err (!%p524_p5)
}
 0x28c   : > { %379 = dma.vmem_to_hbm [thread:$0]  (%p823_p3), %s761_s14, 128, %s766_s17, %s251_s19  }
 0x28d PF: > { %s276_s29 = sand.u32 1, %s558_s9   ;;  %p824_p8 = scmp.ne.s32.totalorder %s816_s22, 0 }
 0x28e   : > { %p825_p9 = scmp.ge.s32.totalorder %s570_s12, 2  ;;  %s277_s7 = scalar_lea.sflag [#allocation4], %s276_s29 }
 0x290   : > { %p389_p0 = pnand %p825_p9, %p824_p8 }
 0x292   : > { %553 = dma.done.wait (!%p389_p0), %s277_s7, 128  }
 0x293   : > { %555 = vsyncadd (!%p389_p0), %s277_s7, 4294967168  ;;  %p18_p1 = scmp.ge.s32.totalorder %s615_s15, 4   ;;  %s826_s9 = smov %s562_s10 }
 0x294   : > { %s827_s10 = smov %s566_s11  ;;  %s828_s11 = smov %s627_s18 }
 0x295   : > { %s829_s12 = smov %s615_s15  ;;  %20 = sbr.rel (!%p18_p1) target bundleno = 7 (0x7), region = 86 }
 0x29c   :  { %282 = vsyncpa [#allocation3], 1 }
 0x29d   :  { %284 = vsyncpa [#allocation3 + $0x1], 1 }
 0x29e   :  { %285 = vsyncpa [#allocation6], 1 }
 0x29f   :  { %287 = vsyncpa [#allocation6 + $0x1], 1 }
 0x2a0   :  { %288 = vsyncpa [#allocation4], 1 }
 0x2a1   :  { %290 = vsyncpa [#allocation4 + $0x1], 1 }

</bundles_post_ra>
